<compile_context>
chip_gen: v5e
topology: v5e:2x2
jax: 0.10.0
libtpu: 0.0.40
codegen_flags: <defaults>
</compile_context>

<pallas_src>
import functools

import jax
import jax.numpy as jnp
from jax.experimental import pallas as pl
from jax.experimental.pallas import tpu as pltpu

BN_EPS = 1e-5
VMEM_LIMIT_BYTES = 32 * 1024 * 1024  # explicit scoped-VMEM budget (v7x-safe)


def _round_up(x, k):
    return (x + k - 1) // k * k


def _pick_tile_m(m, bytes_per_col):
    """Lane-axis (M) tile: multiple of 128, sized so the double-buffered cols
    input block stays around <= 4 MiB (each BlockSpec input is 2x buffered)."""
    tile = 2048
    while tile > 128 and bytes_per_col * tile > 4 * 1024 * 1024:
        tile //= 2
    return min(tile, _round_up(m, 128))


# ----------------------------------------------------------------------------
# Phase 1: 3x3 transposed conv (single MXU matmul) + bias + ReLU, plus
#          per-tile masked BatchNorm partial statistics.
#   colsT : (9*Cin, tile_M) bf16  im2col of dilated+padded input (K on sublanes)
#   w3t   : (Cout, 9*Cin)   bf16  flipped/transposed ConvTranspose2d weights
#   b3    : (Cout, 1)       f32
# outputs
#   h     : (Cout, tile_M)  f32   pre-BN activation (lane-dense stores)
#   ssum  : (1, Cout, 1)    f32   per-tile sum over valid columns
#   ssq   : (1, Cout, 1)    f32   per-tile sum of squares over valid columns
# ----------------------------------------------------------------------------
def _phase1_kernel(colsT_ref, w3t_ref, b3_ref, h_ref, ssum_ref, ssq_ref, *,
                   tile_m, m_valid):
    h = jnp.dot(w3t_ref[...], colsT_ref[...],
                preferred_element_type=jnp.float32)
    h = jnp.maximum(h + b3_ref[...], 0.0)
    h_ref[...] = h
    # Mask the zero-padded tail columns out of the batch statistics.
    col = pl.program_id(0) * tile_m + jax.lax.broadcasted_iota(
        jnp.int32, h.shape, 1)
    hm = jnp.where(col < m_valid, h, 0.0)
    ssum_ref[...] = jnp.sum(hm, axis=1, keepdims=True)[None]
    ssq_ref[...] = jnp.sum(hm * hm, axis=1, keepdims=True)[None]


# Phase 2a: identity residual (stride==1, cin==cout): BN affine + x add (VPU).
def _phase2_identity_kernel(h_ref, xres_ref, scale_ref, shift_ref, o_ref):
    o_ref[...] = h_ref[...] * scale_ref[...] + shift_ref[...] + xres_ref[...]


# Phase 2b: projected residual: 1x1 ConvTranspose2d (tiny matmul) + BN affine.
def _phase2_proj_kernel(h_ref, xres_ref, w1t_ref, b1_ref, scale_ref,
                        shift_ref, o_ref):
    res = jnp.dot(w1t_ref[...], xres_ref[...],
                  preferred_element_type=jnp.float32) + b1_ref[...]
    o_ref[...] = h_ref[...] * scale_ref[...] + shift_ref[...] + res


# ----------------------------------------------------------------------------
# Pallas wrapper for one fused layer (two pallas_calls + tiny stat glue).
# ----------------------------------------------------------------------------
def _block_pallas(colsT, xresT, p, m):
    k = colsT.shape[0]
    cin = xresT.shape[0]
    cout = p["cout"]
    tile_m = _pick_tile_m(m, colsT.dtype.itemsize * k)
    mpad = _round_up(m, tile_m)
    nt = mpad // tile_m
    colsT = jnp.pad(colsT, ((0, 0), (0, mpad - m)))
    xresT = jnp.pad(xresT, ((0, 0), (0, mpad - m)))

    cparams = pltpu.CompilerParams(
        dimension_semantics=("parallel",),  # v7x: split M tiles over both TCs
        vmem_limit_bytes=VMEM_LIMIT_BYTES)

    row_spec = pl.BlockSpec((cout, tile_m), lambda i: (0, i))
    col_vec = pl.BlockSpec((cout, 1), lambda i: (0, 0))
    stat_spec = pl.BlockSpec((1, cout, 1), lambda i: (i, 0, 0))

    h, ssum, ssq = pl.pallas_call(
        functools.partial(_phase1_kernel, tile_m=tile_m, m_valid=m),
        out_shape=(jax.ShapeDtypeStruct((cout, mpad), jnp.float32),
                   jax.ShapeDtypeStruct((nt, cout, 1), jnp.float32),
                   jax.ShapeDtypeStruct((nt, cout, 1), jnp.float32)),
        grid=(nt,),
        in_specs=[pl.BlockSpec((k, tile_m), lambda i: (0, i)),
                  pl.BlockSpec((cout, k), lambda i: (0, 0)),
                  col_vec],
        out_specs=(row_spec, stat_spec, stat_spec),
        compiler_params=cparams,
    )(colsT, p["w3t"], p["b3"])

    # Combine the (tiny) per-tile partial stats and fold training-mode BN into
    # a per-channel affine: single-pass var = E[h^2] - mean^2, all f32.
    s1 = jnp.sum(ssum, axis=0)
    s2 = jnp.sum(ssq, axis=0)
    mean = s1 / m
    var = s2 / m - mean * mean
    scale = p["gamma"] * jax.lax.rsqrt(var + BN_EPS)
    shift = p["beta"] - mean * scale

    if p["normal"]:
        out = pl.pallas_call(
            _phase2_identity_kernel,
            out_shape=jax.ShapeDtypeStruct((cout, mpad), jnp.float32),
            grid=(nt,),
            in_specs=[row_spec, row_spec, col_vec, col_vec],
            out_specs=row_spec,
            compiler_params=cparams,
        )(h, xresT, scale, shift)
    else:
        out = pl.pallas_call(
            _phase2_proj_kernel,
            out_shape=jax.ShapeDtypeStruct((cout, mpad), jnp.float32),
            grid=(nt,),
            in_specs=[row_spec,
                      pl.BlockSpec((cin, tile_m), lambda i: (0, i)),
                      pl.BlockSpec((cout, cin), lambda i: (0, 0)),
                      col_vec, col_vec, col_vec],
            out_specs=row_spec,
            compiler_params=cparams,
        )(h, xresT, p["w1t"], p["b1"], scale, shift)
    return out


# Pure-JAX reference with identical math / precision (sanity check only).
def _block_ref(colsT, xresT, p, m):
    h = jnp.dot(p["w3t"], colsT, preferred_element_type=jnp.float32) + p["b3"]
    h = jnp.maximum(h, 0.0)
    mean = jnp.mean(h, axis=1, keepdims=True)
    var = jnp.mean(h * h, axis=1, keepdims=True) - mean * mean
    scale = p["gamma"] * jax.lax.rsqrt(var + BN_EPS)
    shift = p["beta"] - mean * scale
    if p["normal"]:
        res = xresT
    else:
        res = jnp.dot(p["w1t"], xresT,
                      preferred_element_type=jnp.float32) + p["b1"]
    return scale * h + shift + res


# ----------------------------------------------------------------------------
# Layer glue: dilation, padding, channels-first im2col (compute in Pallas).
# ----------------------------------------------------------------------------
def _apply_block(x, p, use_pallas=True):
    n, cin, hh, ww = x.shape
    s, cout = p["stride"], p["cout"]
    if s == 1:
        xd = x
    else:
        # ConvTranspose2d(stride=s) == zero-dilate by s, pad by k-1-padding,
        # then a direct conv with the flipped kernel.
        # TODO(synk): replace zero-dilation with the s*s sub-pixel phase
        # decomposition to avoid spending ~(s^2-1)/s^2 of MXU FLOPs / im2col
        # bytes on structural zeros for strided layers.
        hd, wd = (hh - 1) * s + 1, (ww - 1) * s + 1
        xd = jnp.zeros((n, cin, hd, wd), x.dtype).at[:, :, ::s, ::s].set(x)
    ho, wo = xd.shape[2], xd.shape[3]
    m = n * ho * wo
    xdp = jnp.pad(xd, ((0, 0), (0, 0), (1, 1), (1, 1)))
    # Channels-first im2col, K ordered (kh, kw, ic); K on sublanes, flattened
    # spatial M on the 128-lane axis (matmul-ready, bf16 MXU inputs).
    # TODO(synk): fold the im2col into the kernel (halo'd row DMA of xdp) to
    # cut the ~9x HBM materialization of this array on large inputs.
    patches = jnp.stack([xdp[:, :, kh:kh + ho, kw:kw + wo]
                         for kh in range(3) for kw in range(3)], axis=0)
    colsT = jnp.transpose(patches, (0, 2, 1, 3, 4)).reshape(9 * cin, m)
    colsT = colsT.astype(jnp.bfloat16)
    # Residual input (dilated, unpadded), same (C, M) layout, kept f32.
    xresT = jnp.transpose(xd, (1, 0, 2, 3)).reshape(cin, m)
    fn = _block_pallas if use_pallas else _block_ref
    outT = fn(colsT, xresT, p, m)
    out = outT[:, :m].reshape(cout, n, ho, wo)
    return jnp.transpose(out, (1, 0, 2, 3))  # -> NCHW


def conv_transpose_net_forward(x_nchw, layers, use_pallas=True):
    h = x_nchw.astype(jnp.float32)
    for p in layers:
        if p["type"] == "pad":
            q = p["pad"]
            h = jnp.pad(h, ((0, 0), (0, 0), (q, q), (q, q)))  # nn.ZeroPad2d
        else:
            h = _apply_block(h, p, use_pallas=use_pallas)
    return h  # last_activation defaults to identity


# ----------------------------------------------------------------------------
# Deterministic parameters mirroring ConvTransposeNet.__init__, stored in
# matmul-ready layouts (flip/transpose/reshape precomputed once here).
# ----------------------------------------------------------------------------
def init_params(net_arch, key):
    layers = []
    for (_, _, cin), (stride, pad, cout) in zip(net_arch[:-1], net_arch[1:]):
        if pad != 0:
            layers.append({"type": "pad", "pad": pad})
        key, k1, k2, k3, k4 = jax.random.split(key, 5)
        # nn.ConvTranspose2d(cin, cout, 3, stride, padding=1): (cin, cout, 3, 3)
        w3 = jax.random.normal(k1, (cin, cout, 3, 3), jnp.float32) * 0.1
        b3 = jax.random.normal(k2, (cout,), jnp.float32) * 0.1
        # flipped+transposed: w3t[oc, (kh*3+kw)*cin+ic] = w3[ic, oc, 2-kh, 2-kw]
        w3t = jnp.transpose(w3[:, :, ::-1, ::-1], (1, 2, 3, 0)).reshape(
            cout, 9 * cin)
        entry = {
            "type": "block", "stride": stride, "cin": cin, "cout": cout,
            "normal": (cin == cout) and (stride == 1),
            "w3t": w3t.astype(jnp.bfloat16),            # bf16 MXU input
            "b3": b3[:, None],                          # (Cout, 1), f32
            "gamma": jnp.ones((cout, 1), jnp.float32),  # BatchNorm2d defaults
            "beta": jnp.zeros((cout, 1), jnp.float32),
        }
        if not entry["normal"]:
            # nn.ConvTranspose2d(cin, cout, kernel_size=1, stride)
            w1 = jax.random.normal(k3, (cin, cout), jnp.float32) * 0.1
            b1 = jax.random.normal(k4, (cout,), jnp.float32) * 0.1
            entry["w1t"] = jnp.transpose(w1)            # (Cout, Cin), f32
            entry["b1"] = b1[:, None]                   # (Cout, 1)
        layers.append(entry)
    return layers


if __name__ == "__main__":
    # net_arch entries are (stride, pad, channels); first entry's stride/pad
    # are unused (mirrors the PyTorch constructor).
    net_arch = [(1, 0, 4), (1, 0, 4), (2, 1, 8)]
    key = jax.random.PRNGKey(0)
    key, kx = jax.random.split(key)
    x = jax.random.normal(kx, (2, 4, 8, 8), jnp.float32)  # NCHW, like PyTorch

    params = init_params(net_arch, key)

    fwd = jax.jit(lambda xx: conv_transpose_net_forward(xx, params, True))
    out = jax.block_until_ready(fwd(x))

    # Sanity check vs a pure-JAX reference with identical math and precision.
    ref = jax.jit(lambda xx: conv_transpose_net_forward(xx, params, False))
    out_ref = jax.block_until_ready(ref(x))

    assert out.shape == (2, 8, 19, 19), out.shape
    err = float(jnp.max(jnp.abs(out - out_ref)))
    assert err < 1e-3, err

    print("KERNEL_OK")
</pallas_src>

<mosaic_0001>
module attributes {stable_mosaic.version = 11 : i64} {
  func.func @_phase1_kernel(%arg0: i32, %arg1: memref<36x128xbf16, #tpu.memory_space<vmem>>, %arg2: memref<4x36xbf16, #tpu.memory_space<vmem>>, %arg3: memref<4x1xf32, #tpu.memory_space<vmem>>, %arg4: memref<4x128xf32, #tpu.memory_space<vmem>>, %arg5: memref<1x4x1xf32, #tpu.memory_space<vmem>>, %arg6: memref<1x4x1xf32, #tpu.memory_space<vmem>>) attributes {dimension_semantics = [#tpu.dimension_semantics<parallel>], iteration_bounds = array<i64: 1>, scalar_prefetch = 0 : i64, scratch_operands = 0 : i64, tpu.core_type = #tpu.core_type<tc>, window_params = [{transform_indices = @transform_0, window_bounds = array<i64: 36, 128>}, {pipeline_mode = #tpu.pipeline_mode<synchronous>, transform_indices = @transform_1, window_bounds = array<i64: 4, 36>}, {pipeline_mode = #tpu.pipeline_mode<synchronous>, transform_indices = @transform_2, window_bounds = array<i64: 4, 1>}, {transform_indices = @transform_3, window_bounds = array<i64: 4, 128>}, {transform_indices = @transform_4, window_bounds = array<i64: 1, 4, 1>}, {transform_indices = @transform_5, window_bounds = array<i64: 1, 4, 1>}]} {
    %c0 = arith.constant 0 : index
    %c0_0 = arith.constant 0 : index
    %0 = vector.load %arg2[%c0, %c0_0] : memref<4x36xbf16, #tpu.memory_space<vmem>>, vector<4x36xbf16>
    %c0_1 = arith.constant 0 : index
    %c0_2 = arith.constant 0 : index
    %1 = vector.load %arg1[%c0_1, %c0_2] : memref<36x128xbf16, #tpu.memory_space<vmem>>, vector<36x128xbf16>
    %cst = arith.constant dense<0.000000e+00> : vector<4x128xf32>
    %2 = tpu.matmul %0, %1, %cst {dimension_numbers = #tpu.dot_dimension_numbers<[1], [0], [0], [1], [0, 0, 1, 1], [], []>} : vector<4x36xbf16>, vector<36x128xbf16>, vector<4x128xf32> -> vector<4x128xf32>
    %c0_3 = arith.constant 0 : index
    %c0_4 = arith.constant 0 : index
    %3 = vector.load %arg3[%c0_3, %c0_4] : memref<4x1xf32, #tpu.memory_space<vmem>>, vector<4x1xf32>
    %4 = vector.broadcast %3 : vector<4x1xf32> to vector<4x128xf32>
    %5 = arith.addf %2, %4 : vector<4x128xf32>
    %cst_5 = arith.constant 0.000000e+00 : f32
    %6 = vector.broadcast %cst_5 : f32 to vector<4x128xf32>
    %7 = arith.maximumf %5, %6 : vector<4x128xf32>
    %c0_6 = arith.constant 0 : index
    %c0_7 = arith.constant 0 : index
    %8 = vector.load %arg4[%c0_6, %c0_7] : memref<4x128xf32, #tpu.memory_space<vmem>>, vector<4x128xf32>
    tpu.vector_store %arg4[%c0_6, %c0_7], %7 {strides = array<i32>} : memref<4x128xf32, #tpu.memory_space<vmem>>, vector<4x128xf32>,
    %c128_i32 = arith.constant 128 : i32
    %9 = arith.muli %arg0, %c128_i32 : i32
    %10 = tpu.iota {dimensions = array<i32: 1>} : vector<4x128xi32>
    %11 = vector.broadcast %9 : i32 to vector<4x128xi32>
    %12 = arith.addi %11, %10 : vector<4x128xi32>
    %c128_i32_8 = arith.constant 128 : i32
    %13 = vector.broadcast %c128_i32_8 : i32 to vector<4x128xi32>
    %14 = arith.cmpi slt, %12, %13 : vector<4x128xi32>
    %cst_9 = arith.constant 0.000000e+00 : f32
    %15 = vector.broadcast %cst_9 : f32 to vector<4x128xf32>
    %16 = arith.select %14, %7, %15 : vector<4x128xi1>, vector<4x128xf32>
    %cst_10 = arith.constant dense<0.000000e+00> : vector<4xf32>
    %17 = vector.multi_reduction <add>, %16, %cst_10 [1] : vector<4x128xf32> to vector<4xf32>
    %18 = vector.shape_cast %17 : vector<4xf32> to vector<4x1xf32>
    %19 = vector.shape_cast %18 : vector<4x1xf32> to vector<1x4x1xf32>
    %c0_11 = arith.constant 0 : index
    %c0_12 = arith.constant 0 : index
    %c0_13 = arith.constant 0 : index
    %20 = vector.load %arg5[%c0_11, %c0_12, %c0_13] : memref<1x4x1xf32, #tpu.memory_space<vmem>>, vector<1x4x1xf32>
    tpu.vector_store %arg5[%c0_11, %c0_12, %c0_13], %19 {strides = array<i32>} : memref<1x4x1xf32, #tpu.memory_space<vmem>>, vector<1x4x1xf32>,
    %21 = arith.mulf %16, %16 : vector<4x128xf32>
    %cst_14 = arith.constant dense<0.000000e+00> : vector<4xf32>
    %22 = vector.multi_reduction <add>, %21, %cst_14 [1] : vector<4x128xf32> to vector<4xf32>
    %23 = vector.shape_cast %22 : vector<4xf32> to vector<4x1xf32>
    %24 = vector.shape_cast %23 : vector<4x1xf32> to vector<1x4x1xf32>
    %c0_15 = arith.constant 0 : index
    %c0_16 = arith.constant 0 : index
    %c0_17 = arith.constant 0 : index
    %25 = vector.load %arg6[%c0_15, %c0_16, %c0_17] : memref<1x4x1xf32, #tpu.memory_space<vmem>>, vector<1x4x1xf32>
    tpu.vector_store %arg6[%c0_15, %c0_16, %c0_17], %24 {strides = array<i32>} : memref<1x4x1xf32, #tpu.memory_space<vmem>>, vector<1x4x1xf32>,
    return
  }
  func.func @transform_0(%arg0: i32) -> (i32, i32) {
    %c0_i32 = arith.constant 0 : i32
    %c0_i32_0 = arith.constant 0 : i32
    return %c0_i32, %arg0 : i32, i32
  }
  func.func @transform_1(%arg0: i32) -> (i32, i32) {
    %c0_i32 = arith.constant 0 : i32
    %c0_i32_0 = arith.constant 0 : i32
    %c0_i32_1 = arith.constant 0 : i32
    return %c0_i32, %c0_i32_0 : i32, i32
  }
  func.func @transform_2(%arg0: i32) -> (i32, i32) {
    %c0_i32 = arith.constant 0 : i32
    %c0_i32_0 = arith.constant 0 : i32
    %c0_i32_1 = arith.constant 0 : i32
    return %c0_i32, %c0_i32_0 : i32, i32
  }
  func.func @transform_3(%arg0: i32) -> (i32, i32) {
    %c0_i32 = arith.constant 0 : i32
    %c0_i32_0 = arith.constant 0 : i32
    return %c0_i32, %arg0 : i32, i32
  }
  func.func @transform_4(%arg0: i32) -> (i32, i32, i32) {
    %c0_i32 = arith.constant 0 : i32
    %c0_i32_0 = arith.constant 0 : i32
    %c0_i32_1 = arith.constant 0 : i32
    return %arg0, %c0_i32, %c0_i32_0 : i32, i32, i32
  }
  func.func @transform_5(%arg0: i32) -> (i32, i32, i32) {
    %c0_i32 = arith.constant 0 : i32
    %c0_i32_0 = arith.constant 0 : i32
    %c0_i32_1 = arith.constant 0 : i32
    return %arg0, %c0_i32, %c0_i32_0 : i32, i32, i32
  }
}

module attributes {stable_mosaic.version = 11 : i64} {
  func.func @_phase2_identity_kernel(%arg0: i32, %arg1: memref<4x128xf32, #tpu.memory_space<vmem>>, %arg2: memref<4x128xf32, #tpu.memory_space<vmem>>, %arg3: memref<4x1xf32, #tpu.memory_space<vmem>>, %arg4: memref<4x1xf32, #tpu.memory_space<vmem>>, %arg5: memref<4x128xf32, #tpu.memory_space<vmem>>) attributes {dimension_semantics = [#tpu.dimension_semantics<parallel>], iteration_bounds = array<i64: 1>, scalar_prefetch = 0 : i64, scratch_operands = 0 : i64, tpu.core_type = #tpu.core_type<tc>, window_params = [{transform_indices = @transform_0, window_bounds = array<i64: 4, 128>}, {transform_indices = @transform_1, window_bounds = array<i64: 4, 128>}, {pipeline_mode = #tpu.pipeline_mode<synchronous>, transform_indices = @transform_2, window_bounds = array<i64: 4, 1>}, {pipeline_mode = #tpu.pipeline_mode<synchronous>, transform_indices = @transform_3, window_bounds = array<i64: 4, 1>}, {transform_indices = @transform_4, window_bounds = array<i64: 4, 128>}]} {
    %c0 = arith.constant 0 : index
    %c0_0 = arith.constant 0 : index
    %0 = vector.load %arg1[%c0, %c0_0] : memref<4x128xf32, #tpu.memory_space<vmem>>, vector<4x128xf32>
    %c0_1 = arith.constant 0 : index
    %c0_2 = arith.constant 0 : index
    %1 = vector.load %arg3[%c0_1, %c0_2] : memref<4x1xf32, #tpu.memory_space<vmem>>, vector<4x1xf32>
    %2 = vector.broadcast %1 : vector<4x1xf32> to vector<4x128xf32>
    %3 = arith.mulf %0, %2 : vector<4x128xf32>
    %c0_3 = arith.constant 0 : index
    %c0_4 = arith.constant 0 : index
    %4 = vector.load %arg4[%c0_3, %c0_4] : memref<4x1xf32, #tpu.memory_space<vmem>>, vector<4x1xf32>
    %5 = vector.broadcast %4 : vector<4x1xf32> to vector<4x128xf32>
    %6 = arith.addf %3, %5 : vector<4x128xf32>
    %c0_5 = arith.constant 0 : index
    %c0_6 = arith.constant 0 : index
    %7 = vector.load %arg2[%c0_5, %c0_6] : memref<4x128xf32, #tpu.memory_space<vmem>>, vector<4x128xf32>
    %8 = arith.addf %6, %7 : vector<4x128xf32>
    %c0_7 = arith.constant 0 : index
    %c0_8 = arith.constant 0 : index
    %9 = vector.load %arg5[%c0_7, %c0_8] : memref<4x128xf32, #tpu.memory_space<vmem>>, vector<4x128xf32>
    tpu.vector_store %arg5[%c0_7, %c0_8], %8 {strides = array<i32>} : memref<4x128xf32, #tpu.memory_space<vmem>>, vector<4x128xf32>,
    return
  }
  func.func @transform_0(%arg0: i32) -> (i32, i32) {
    %c0_i32 = arith.constant 0 : i32
    %c0_i32_0 = arith.constant 0 : i32
    return %c0_i32, %arg0 : i32, i32
  }
  func.func @transform_1(%arg0: i32) -> (i32, i32) {
    %c0_i32 = arith.constant 0 : i32
    %c0_i32_0 = arith.constant 0 : i32
    return %c0_i32, %arg0 : i32, i32
  }
  func.func @transform_2(%arg0: i32) -> (i32, i32) {
    %c0_i32 = arith.constant 0 : i32
    %c0_i32_0 = arith.constant 0 : i32
    %c0_i32_1 = arith.constant 0 : i32
    return %c0_i32, %c0_i32_0 : i32, i32
  }
  func.func @transform_3(%arg0: i32) -> (i32, i32) {
    %c0_i32 = arith.constant 0 : i32
    %c0_i32_0 = arith.constant 0 : i32
    %c0_i32_1 = arith.constant 0 : i32
    return %c0_i32, %c0_i32_0 : i32, i32
  }
  func.func @transform_4(%arg0: i32) -> (i32, i32) {
    %c0_i32 = arith.constant 0 : i32
    %c0_i32_0 = arith.constant 0 : i32
    return %c0_i32, %arg0 : i32, i32
  }
}

module attributes {stable_mosaic.version = 11 : i64} {
  func.func @_phase1_kernel(%arg0: i32, %arg1: memref<36x768xbf16, #tpu.memory_space<vmem>>, %arg2: memref<8x36xbf16, #tpu.memory_space<vmem>>, %arg3: memref<8x1xf32, #tpu.memory_space<vmem>>, %arg4: memref<8x768xf32, #tpu.memory_space<vmem>>, %arg5: memref<1x8x1xf32, #tpu.memory_space<vmem>>, %arg6: memref<1x8x1xf32, #tpu.memory_space<vmem>>) attributes {dimension_semantics = [#tpu.dimension_semantics<parallel>], iteration_bounds = array<i64: 1>, scalar_prefetch = 0 : i64, scratch_operands = 0 : i64, tpu.core_type = #tpu.core_type<tc>, window_params = [{transform_indices = @transform_0, window_bounds = array<i64: 36, 768>}, {pipeline_mode = #tpu.pipeline_mode<synchronous>, transform_indices = @transform_1, window_bounds = array<i64: 8, 36>}, {pipeline_mode = #tpu.pipeline_mode<synchronous>, transform_indices = @transform_2, window_bounds = array<i64: 8, 1>}, {transform_indices = @transform_3, window_bounds = array<i64: 8, 768>}, {transform_indices = @transform_4, window_bounds = array<i64: 1, 8, 1>}, {transform_indices = @transform_5, window_bounds = array<i64: 1, 8, 1>}]} {
    %c0 = arith.constant 0 : index
    %c0_0 = arith.constant 0 : index
    %0 = vector.load %arg2[%c0, %c0_0] : memref<8x36xbf16, #tpu.memory_space<vmem>>, vector<8x36xbf16>
    %c0_1 = arith.constant 0 : index
    %c0_2 = arith.constant 0 : index
    %1 = vector.load %arg1[%c0_1, %c0_2] : memref<36x768xbf16, #tpu.memory_space<vmem>>, vector<36x768xbf16>
    %cst = arith.constant dense<0.000000e+00> : vector<8x768xf32>
    %2 = tpu.matmul %0, %1, %cst {dimension_numbers = #tpu.dot_dimension_numbers<[1], [0], [0], [1], [0, 0, 1, 1], [], []>} : vector<8x36xbf16>, vector<36x768xbf16>, vector<8x768xf32> -> vector<8x768xf32>
    %c0_3 = arith.constant 0 : index
    %c0_4 = arith.constant 0 : index
    %3 = vector.load %arg3[%c0_3, %c0_4] : memref<8x1xf32, #tpu.memory_space<vmem>>, vector<8x1xf32>
    %4 = vector.broadcast %3 : vector<8x1xf32> to vector<8x768xf32>
    %5 = arith.addf %2, %4 : vector<8x768xf32>
    %cst_5 = arith.constant 0.000000e+00 : f32
    %6 = vector.broadcast %cst_5 : f32 to vector<8x768xf32>
    %7 = arith.maximumf %5, %6 : vector<8x768xf32>
    %c0_6 = arith.constant 0 : index
    %c0_7 = arith.constant 0 : index
    %8 = vector.load %arg4[%c0_6, %c0_7] : memref<8x768xf32, #tpu.memory_space<vmem>>, vector<8x768xf32>
    tpu.vector_store %arg4[%c0_6, %c0_7], %7 {strides = array<i32>} : memref<8x768xf32, #tpu.memory_space<vmem>>, vector<8x768xf32>,
    %c768_i32 = arith.constant 768 : i32
    %9 = arith.muli %arg0, %c768_i32 : i32
    %10 = tpu.iota {dimensions = array<i32: 1>} : vector<8x768xi32>
    %11 = vector.broadcast %9 : i32 to vector<8x768xi32>
    %12 = arith.addi %11, %10 : vector<8x768xi32>
    %c722_i32 = arith.constant 722 : i32
    %13 = vector.broadcast %c722_i32 : i32 to vector<8x768xi32>
    %14 = arith.cmpi slt, %12, %13 : vector<8x768xi32>
    %cst_8 = arith.constant 0.000000e+00 : f32
    %15 = vector.broadcast %cst_8 : f32 to vector<8x768xf32>
    %16 = arith.select %14, %7, %15 : vector<8x768xi1>, vector<8x768xf32>
    %cst_9 = arith.constant dense<0.000000e+00> : vector<8xf32>
    %17 = vector.multi_reduction <add>, %16, %cst_9 [1] : vector<8x768xf32> to vector<8xf32>
    %18 = vector.shape_cast %17 : vector<8xf32> to vector<8x1xf32>
    %19 = vector.shape_cast %18 : vector<8x1xf32> to vector<1x8x1xf32>
    %c0_10 = arith.constant 0 : index
    %c0_11 = arith.constant 0 : index
    %c0_12 = arith.constant 0 : index
    %20 = vector.load %arg5[%c0_10, %c0_11, %c0_12] : memref<1x8x1xf32, #tpu.memory_space<vmem>>, vector<1x8x1xf32>
    tpu.vector_store %arg5[%c0_10, %c0_11, %c0_12], %19 {strides = array<i32>} : memref<1x8x1xf32, #tpu.memory_space<vmem>>, vector<1x8x1xf32>,
    %21 = arith.mulf %16, %16 : vector<8x768xf32>
    %cst_13 = arith.constant dense<0.000000e+00> : vector<8xf32>
    %22 = vector.multi_reduction <add>, %21, %cst_13 [1] : vector<8x768xf32> to vector<8xf32>
    %23 = vector.shape_cast %22 : vector<8xf32> to vector<8x1xf32>
    %24 = vector.shape_cast %23 : vector<8x1xf32> to vector<1x8x1xf32>
    %c0_14 = arith.constant 0 : index
    %c0_15 = arith.constant 0 : index
    %c0_16 = arith.constant 0 : index
    %25 = vector.load %arg6[%c0_14, %c0_15, %c0_16] : memref<1x8x1xf32, #tpu.memory_space<vmem>>, vector<1x8x1xf32>
    tpu.vector_store %arg6[%c0_14, %c0_15, %c0_16], %24 {strides = array<i32>} : memref<1x8x1xf32, #tpu.memory_space<vmem>>, vector<1x8x1xf32>,
    return
  }
  func.func @transform_0(%arg0: i32) -> (i32, i32) {
    %c0_i32 = arith.constant 0 : i32
    %c0_i32_0 = arith.constant 0 : i32
    return %c0_i32, %arg0 : i32, i32
  }
  func.func @transform_1(%arg0: i32) -> (i32, i32) {
    %c0_i32 = arith.constant 0 : i32
    %c0_i32_0 = arith.constant 0 : i32
    %c0_i32_1 = arith.constant 0 : i32
    return %c0_i32, %c0_i32_0 : i32, i32
  }
  func.func @transform_2(%arg0: i32) -> (i32, i32) {
    %c0_i32 = arith.constant 0 : i32
    %c0_i32_0 = arith.constant 0 : i32
    %c0_i32_1 = arith.constant 0 : i32
    return %c0_i32, %c0_i32_0 : i32, i32
  }
  func.func @transform_3(%arg0: i32) -> (i32, i32) {
    %c0_i32 = arith.constant 0 : i32
    %c0_i32_0 = arith.constant 0 : i32
    return %c0_i32, %arg0 : i32, i32
  }
  func.func @transform_4(%arg0: i32) -> (i32, i32, i32) {
    %c0_i32 = arith.constant 0 : i32
    %c0_i32_0 = arith.constant 0 : i32
    %c0_i32_1 = arith.constant 0 : i32
    return %arg0, %c0_i32, %c0_i32_0 : i32, i32, i32
  }
  func.func @transform_5(%arg0: i32) -> (i32, i32, i32) {
    %c0_i32 = arith.constant 0 : i32
    %c0_i32_0 = arith.constant 0 : i32
    %c0_i32_1 = arith.constant 0 : i32
    return %arg0, %c0_i32, %c0_i32_0 : i32, i32, i32
  }
}

module attributes {stable_mosaic.version = 11 : i64} {
  func.func @_phase2_proj_kernel(%arg0: i32, %arg1: memref<8x768xf32, #tpu.memory_space<vmem>>, %arg2: memref<4x768xf32, #tpu.memory_space<vmem>>, %arg3: memref<8x4xf32, #tpu.memory_space<vmem>>, %arg4: memref<8x1xf32, #tpu.memory_space<vmem>>, %arg5: memref<8x1xf32, #tpu.memory_space<vmem>>, %arg6: memref<8x1xf32, #tpu.memory_space<vmem>>, %arg7: memref<8x768xf32, #tpu.memory_space<vmem>>) attributes {dimension_semantics = [#tpu.dimension_semantics<parallel>], iteration_bounds = array<i64: 1>, scalar_prefetch = 0 : i64, scratch_operands = 0 : i64, tpu.core_type = #tpu.core_type<tc>, window_params = [{transform_indices = @transform_0, window_bounds = array<i64: 8, 768>}, {transform_indices = @transform_1, window_bounds = array<i64: 4, 768>}, {pipeline_mode = #tpu.pipeline_mode<synchronous>, transform_indices = @transform_2, window_bounds = array<i64: 8, 4>}, {pipeline_mode = #tpu.pipeline_mode<synchronous>, transform_indices = @transform_3, window_bounds = array<i64: 8, 1>}, {pipeline_mode = #tpu.pipeline_mode<synchronous>, transform_indices = @transform_4, window_bounds = array<i64: 8, 1>}, {pipeline_mode = #tpu.pipeline_mode<synchronous>, transform_indices = @transform_5, window_bounds = array<i64: 8, 1>}, {transform_indices = @transform_6, window_bounds = array<i64: 8, 768>}]} {
    %c0 = arith.constant 0 : index
    %c0_0 = arith.constant 0 : index
    %0 = vector.load %arg3[%c0, %c0_0] : memref<8x4xf32, #tpu.memory_space<vmem>>, vector<8x4xf32>
    %c0_1 = arith.constant 0 : index
    %c0_2 = arith.constant 0 : index
    %1 = vector.load %arg2[%c0_1, %c0_2] : memref<4x768xf32, #tpu.memory_space<vmem>>, vector<4x768xf32>
    %cst = arith.constant dense<0.000000e+00> : vector<8x768xf32>
    %2 = tpu.matmul %0, %1, %cst {dimension_numbers = #tpu.dot_dimension_numbers<[1], [0], [0], [1], [0, 0, 1, 1], [], []>} : vector<8x4xf32>, vector<4x768xf32>, vector<8x768xf32> -> vector<8x768xf32>
    %c0_3 = arith.constant 0 : index
    %c0_4 = arith.constant 0 : index
    %3 = vector.load %arg4[%c0_3, %c0_4] : memref<8x1xf32, #tpu.memory_space<vmem>>, vector<8x1xf32>
    %4 = vector.broadcast %3 : vector<8x1xf32> to vector<8x768xf32>
    %5 = arith.addf %2, %4 : vector<8x768xf32>
    %c0_5 = arith.constant 0 : index
    %c0_6 = arith.constant 0 : index
    %6 = vector.load %arg1[%c0_5, %c0_6] : memref<8x768xf32, #tpu.memory_space<vmem>>, vector<8x768xf32>
    %c0_7 = arith.constant 0 : index
    %c0_8 = arith.constant 0 : index
    %7 = vector.load %arg5[%c0_7, %c0_8] : memref<8x1xf32, #tpu.memory_space<vmem>>, vector<8x1xf32>
    %8 = vector.broadcast %7 : vector<8x1xf32> to vector<8x768xf32>
    %9 = arith.mulf %6, %8 : vector<8x768xf32>
    %c0_9 = arith.constant 0 : index
    %c0_10 = arith.constant 0 : index
    %10 = vector.load %arg6[%c0_9, %c0_10] : memref<8x1xf32, #tpu.memory_space<vmem>>, vector<8x1xf32>
    %11 = vector.broadcast %10 : vector<8x1xf32> to vector<8x768xf32>
    %12 = arith.addf %9, %11 : vector<8x768xf32>
    %13 = arith.addf %12, %5 : vector<8x768xf32>
    %c0_11 = arith.constant 0 : index
    %c0_12 = arith.constant 0 : index
    %14 = vector.load %arg7[%c0_11, %c0_12] : memref<8x768xf32, #tpu.memory_space<vmem>>, vector<8x768xf32>
    tpu.vector_store %arg7[%c0_11, %c0_12], %13 {strides = array<i32>} : memref<8x768xf32, #tpu.memory_space<vmem>>, vector<8x768xf32>,
    return
  }
  func.func @transform_0(%arg0: i32) -> (i32, i32) {
    %c0_i32 = arith.constant 0 : i32
    %c0_i32_0 = arith.constant 0 : i32
    return %c0_i32, %arg0 : i32, i32
  }
  func.func @transform_1(%arg0: i32) -> (i32, i32) {
    %c0_i32 = arith.constant 0 : i32
    %c0_i32_0 = arith.constant 0 : i32
    return %c0_i32, %arg0 : i32, i32
  }
  func.func @transform_2(%arg0: i32) -> (i32, i32) {
    %c0_i32 = arith.constant 0 : i32
    %c0_i32_0 = arith.constant 0 : i32
    %c0_i32_1 = arith.constant 0 : i32
    return %c0_i32, %c0_i32_0 : i32, i32
  }
  func.func @transform_3(%arg0: i32) -> (i32, i32) {
    %c0_i32 = arith.constant 0 : i32
    %c0_i32_0 = arith.constant 0 : i32
    %c0_i32_1 = arith.constant 0 : i32
    return %c0_i32, %c0_i32_0 : i32, i32
  }
  func.func @transform_4(%arg0: i32) -> (i32, i32) {
    %c0_i32 = arith.constant 0 : i32
    %c0_i32_0 = arith.constant 0 : i32
    %c0_i32_1 = arith.constant 0 : i32
    return %c0_i32, %c0_i32_0 : i32, i32
  }
  func.func @transform_5(%arg0: i32) -> (i32, i32) {
    %c0_i32 = arith.constant 0 : i32
    %c0_i32_0 = arith.constant 0 : i32
    %c0_i32_1 = arith.constant 0 : i32
    return %c0_i32, %c0_i32_0 : i32, i32
  }
  func.func @transform_6(%arg0: i32) -> (i32, i32) {
    %c0_i32 = arith.constant 0 : i32
    %c0_i32_0 = arith.constant 0 : i32
    return %c0_i32, %arg0 : i32, i32
  }
}

</mosaic_0001>

<bundles_post_ra>
// kernel: _lambda_.4
= control target key start
LH: loop header
LB: loop body
LE: loop exit
PB: predicated region body
PF: predicated region fallthrough
CT: control target
= control target key end

     0   :  { %v111_v1 = vmov 0   ;;  %vm49_vm0 = vcmask 1041408   ;;  %vm45_vm1 = vcmask 293888   ;;  %vm75_vm2 = vcmask 1043456   ;;  %s166_s0 = inlined_call_operand.vmem [shape: bf16[36,128], index: 0, kind: input, shape index: {}]   ;;  %s167_s2 = inlined_call_operand.vmem [shape: f32[4,1], index: 2, kind: input, shape index: {}]   ;;  %s168_s1 = inlined_call_operand.vmem [shape: bf16[4,36], index: 1, kind: input, shape index: {}]   ;;  %s169_s3 = inlined_call_operand.vmem [shape: f32[4,128], index: 3, kind: output, shape index: {0}]   ;;  %s170_s4 = inlined_call_operand.vmem [shape: f32[1,4,1], index: 4, kind: output, shape index: {1}]   ;;  %s171_s5 = inlined_call_operand.vmem [shape: f32[1,4,1], index: 5, kind: output, shape index: {2}]  }
   0x1   :  { %v23_v0 = vld [vmem:[%s166_s0 + $0x10] sm:$0x3]  ;;  %110 = vset.pattern.permute.xlu0 %v111_v1  ;;  %v24_v3 = vld [vmem:[%s167_s2] sm:$0xf]  ;;  %v108_v6 = vld [vmem:[%s166_s0 + $0x8] sm:$0xff]  ;;  %vm79_vm3 = vcmask 3072  }
   0x2   :  { %v39_v2 = vunpack.c.l.b16 %v23_v0  ;;  %27 = vperm.xlu0 %110, %v24_v3   ;;  %v107_v7 = vld [vmem:[%s166_s0] sm:$0xff] }
   0x3   :  { %v18_v8 = vld [vmem:[%s168_s1] sm:$0x3] }
   0x4   :  { %v42_v4 = vpack.c.b16 %v39_v2, %v39_v2 }
   0x6   :  { %v51_v5 = vsel %vm49_vm0, %v42_v4, 0 }
   0x7   :  { %58 = vmatpush.bf16.msra.mxu0 %v51_v5 }
   0xb   :  { %59 = vmatpush.bf16.msra.mxu0 %v108_v6 }
   0xf   :  { %60 = vmatpush.bf16.msra.mxu0 %v107_v7 }
  0x12   :  { %106 = vmatmul.msk.bf16.vlgmr.msra.gmra.mxu0 %vm45_vm1, %v18_v8 }
  0x74   :  { %v28_v9 = vpop.permute.xlu0 %27 }
  0x8f   :  { %v62_v10 = vpop.f32.mrf.mxu0 }
  0x90   :  { %v63_v11 = vadd.f32 %v62_v10, %v28_v9 }
  0x92   :  { %v66_v12 = vmax.f32 %v63_v11, 0.0 }
  0x94   :  { %67 = vst [vmem:[%s169_s3] sm:$0xf] %v66_v12  ;;  %v76_v13 = vsel %vm75_vm2, %v66_v12, 0.0  ;;  %v81_v14 = vmul.f32 %v66_v12, %v66_v12 }
  0x95   :  { %77 = vadd.xlane.f32.xlu0 %v76_v13 }
  0x96   :  { %v82_v15 = vsel %vm75_vm2, %v81_v14, 0.0 }
  0x97   :  { %v64_v16 = vpop.f32.mrf.mxu0  ;;  %83 = vadd.xlane.f32.xlu1 %v82_v15 }
 0x108   :  { %v78_v17 = vpop.xlane.xlu0 %77 }
 0x109   :  { %80 = vst.msk [vmem:[%s170_s4] sm:$0xf] %vm79_vm3, %v78_v17 }
 0x10a   :  { %v84_v18 = vpop.xlane.xlu1 %83 }
 0x10b   :  { %85 = vst.msk [vmem:[%s171_s5] sm:$0xf] %vm79_vm3, %v84_v18 }

// kernel: _lambda_.5
= control target key start
LH: loop header
LB: loop body
LE: loop exit
PB: predicated region body
PF: predicated region fallthrough
CT: control target
= control target key end

     0   :  { %v41_v0 = vmov 0   ;;  %s82_s2 = inlined_call_operand.vmem [shape: f32[4,1], index: 2, kind: input, shape index: {}]   ;;  %s83_s3 = inlined_call_operand.vmem [shape: f32[4,1], index: 3, kind: input, shape index: {}]   ;;  %s84_s0 = inlined_call_operand.vmem [shape: f32[4,128], index: 0, kind: input, shape index: {}]   ;;  %s85_s1 = inlined_call_operand.vmem [shape: f32[4,128], index: 1, kind: input, shape index: {}]   ;;  %s86_s4 = inlined_call_operand.vmem [shape: f32[4,128], index: 4, kind: output, shape index: {}]  }
   0x1   :  { %40 = vset.pattern.permute.xlu0 %v41_v0  ;;  %v18_v1 = vld [vmem:[%s82_s2] sm:$0xf] }
   0x2   :  { %21 = vperm.xlu0 %40, %v18_v1   ;;  %v25_v2 = vld [vmem:[%s83_s3] sm:$0xf] }
   0x3   :  { %v17_v4 = vld [vmem:[%s84_s0] sm:$0xf] }
   0x4   :  { %v32_v7 = vld [vmem:[%s85_s1] sm:$0xf] }
   0xa   :  { %28 = vperm.xlu0 %40, %v25_v2  }
  0x74   :  { %v22_v3 = vpop.permute.xlu0 %21 }
  0x75   :  { %v24_v5 = vmul.f32 %v22_v3, %v17_v4 }
  0x7c   :  { %v29_v6 = vpop.permute.xlu0 %28 }
  0x7d   :  { %v31_v8 = vadd.f32 %v29_v6, %v24_v5 }
  0x7f   :  { %v33_v9 = vadd.f32 %v32_v7, %v31_v8 }
  0x81   :  { %34 = vst [vmem:[%s86_s4] sm:$0xf] %v33_v9 }

// kernel: _lambda_.6
= control target key start
LH: loop header
LB: loop body
LE: loop exit
PB: predicated region body
PF: predicated region fallthrough
CT: control target
= control target key end

     0   :  { %v358_v2 = vmov 0   ;;  %vm119_vm0 = vcmask 1041408   ;;  %vm115_vm1 = vcmask 293888   ;;  %vm262_vm3 = vcmask 7168   ;;  %s512_s0 = inlined_call_operand.vmem [shape: bf16[36,768], index: 0, kind: input, shape index: {}]   ;;  %s513_s2 = inlined_call_operand.vmem [shape: f32[8,1], index: 2, kind: input, shape index: {}]   ;;  %s514_s1 = inlined_call_operand.vmem [shape: bf16[8,36], index: 1, kind: input, shape index: {}]   ;;  %s515_s3 = inlined_call_operand.vmem [shape: f32[8,768], index: 3, kind: output, shape index: {0}]   ;;  %s516_s4 = inlined_call_operand.vmem [shape: f32[1,8,1], index: 4, kind: output, shape index: {1}]   ;;  %s517_s5 = inlined_call_operand.vmem [shape: f32[1,8,1], index: 5, kind: output, shape index: {2}]  }
   0x1   :  { %v31_v0 = vld [vmem:[%s512_s0 + $0x60] sm:$0x33]  ;;  %v32_v1 = vld [vmem:[%s512_s0 + $0x68] sm:$0x33]  ;;  %357 = vset.pattern.permute.xlu0 %v358_v2  ;;  %v316_v7 = vld [vmem:[%s512_s0 + $0x30] sm:$0xf] }
   0x2   :  { %v79_v3 = vunpack.c.l.b16 %v31_v0  ;;  %v80_v4 = vunpack.c.h.b16 %v31_v0  ;;  %v81_v5 = vunpack.c.l.b16 %v32_v1  ;;  %v82_v6 = vunpack.c.h.b16 %v32_v1  ;;  %v353_v8 = vld [vmem:[%s512_s0 + $0x44] sm:$0xf0]  ;;  %v350_v13 = vld [vmem:[%s512_s0 + $0x34] sm:$0xf]  ;;  %v318_v14 = vld [vmem:[%s512_s0 + $0x48] sm:$0xf0] }
   0x3   :  { %v324_v15 = vld [vmem:[%s512_s0 + $0x38] sm:$0xf]  ;;  %v354_v16 = vld [vmem:[%s512_s0 + $0x4c] sm:$0xf0]  ;;  %v351_v17 = vld [vmem:[%s512_s0 + $0x3c] sm:$0xf]  ;;  %v317_v24 = vor.u32 %v353_v8, %v316_v7  ;;  %v321_v25 = vor.u32 %v350_v13, %v318_v14 }
   0x4   :  { %v97_v9 = vpack.c.b16 %v79_v3, %v79_v3  ;;  %v98_v10 = vpack.c.b16 %v80_v4, %v80_v4  ;;  %v99_v11 = vpack.c.b16 %v81_v5, %v81_v5  ;;  %v100_v12 = vpack.c.b16 %v82_v6, %v82_v6  ;;  %v326_v18 = vld [vmem:[%s512_s0 + $0x50] sm:$0xf0]  ;;  %v292_v23 = vld [vmem:[%s512_s0] sm:$0xf]  ;;  %v347_v26 = vld [vmem:[%s512_s0 + $0x14] sm:$0xf0] }
   0x5   :  { %v344_v27 = vld [vmem:[%s512_s0 + $0x4] sm:$0xf]  ;;  %v294_v28 = vld [vmem:[%s512_s0 + $0x18] sm:$0xf0]  ;;  %v325_v29 = vor.u32 %v354_v16, %v324_v15  ;;  %v329_v30 = vor.u32 %v351_v17, %v326_v18  ;;  %v300_v31 = vld [vmem:[%s512_s0 + $0x8] sm:$0xf]  ;;  %v293_v39 = vor.u32 %v347_v26, %v292_v23  ;;  %v229_v3 = vlaneseq }
   0x6   :  { %v121_v19 = vsel %vm119_vm0, %v97_v9, 0  ;;  %v124_v20 = vsel %vm119_vm0, %v98_v10, 0  ;;  %v127_v21 = vsel %vm119_vm0, %v99_v11, 0  ;;  %v130_v22 = vsel %vm119_vm0, %v100_v12, 0  ;;  %v348_v32 = vld [vmem:[%s512_s0 + $0x1c] sm:$0xf0] }
   0x7   :  { %143 = vmatpush.bf16.msra.mxu0 %v121_v19  ;;  %156 = vmatpush.bf16.msra.mxu1 %v124_v20  ;;  %v33_v33 = vld [vmem:[%s512_s0 + $0x70] sm:$0x33]  ;;  %v345_v34 = vld [vmem:[%s512_s0 + $0xc] sm:$0xf]  ;;  %v302_v35 = vld [vmem:[%s512_s0 + $0x20] sm:$0xf0]  ;;  %v297_v40 = vor.u32 %v344_v27, %v294_v28  ;;  %v301_v43 = vor.u32 %v348_v32, %v300_v31 }
   0x8   :  { %169 = vmatpush.bf16.msra.mxu2 %v127_v21  ;;  %182 = vmatpush.bf16.msra.mxu3 %v130_v22  ;;  %v83_v36 = vunpack.c.l.b16 %v33_v33  ;;  %v84_v37 = vunpack.c.h.b16 %v33_v33  ;;  %v34_v38 = vld [vmem:[%s513_s2] sm:$0xff]  ;;  %v305_v44 = vor.u32 %v345_v34, %v302_v35  ;;  %v355_v46 = vld [vmem:[%s512_s0 + $0x54] sm:$0xf0]  ;;  %v334_v50 = vld [vmem:[%s512_s0 + $0x58] sm:$0xf0]  ;;  %v230_v11 = vand.u32 127, %v229_v3 }
   0x9   :  { %37 = vperm.xlu0 %357, %v34_v38   ;;  %v332_v45 = vld [vmem:[%s512_s0 + $0x40] sm:$0xf]  ;;  %v352_v49 = vld [vmem:[%s512_s0 + $0x44] sm:$0xf]  ;;  %v308_v54 = vld [vmem:[%s512_s0 + $0x10] sm:$0xf] }
   0xa   :  { %v101_v41 = vpack.c.b16 %v83_v36, %v83_v36  ;;  %v102_v42 = vpack.c.b16 %v84_v37, %v84_v37  ;;  %v18_v51 = vld [vmem:[%s514_s1] sm:$0xf]  ;;  %v333_v52 = vor.u32 %v355_v46, %v332_v45  ;;  %v337_v53 = vor.u32 %v352_v49, %v334_v50  ;;  %v349_v55 = vld [vmem:[%s512_s0 + $0x24] sm:$0xf0]  ;;  %v346_v56 = vld [vmem:[%s512_s0 + $0x14] sm:$0xf] }
   0xb   :  { %144 = vmatpush.bf16.msra.mxu0 %v317_v24  ;;  %157 = vmatpush.bf16.msra.mxu1 %v321_v25  ;;  %v310_v57 = vld [vmem:[%s512_s0 + $0x28] sm:$0xf0]  ;;  %v309_v58 = vor.u32 %v349_v55, %v308_v54  ;;  %v235_v17 = vadd.s32 640, %v230_v11 }
   0xc   :  { %170 = vmatpush.bf16.msra.mxu2 %v325_v29  ;;  %183 = vmatpush.bf16.msra.mxu3 %v329_v30  ;;  %v133_v47 = vsel %vm119_vm0, %v101_v41, 0  ;;  %v136_v48 = vsel %vm119_vm0, %v102_v42, 0  ;;  %v313_v59 = vor.u32 %v346_v56, %v310_v57 }
   0xd   :  { %vm248_vm2 = vcmp.lt.s32.totalorder %v235_v17, 722 }
   0xf   :  { %145 = vmatpush.bf16.msra.mxu0 %v293_v39  ;;  %158 = vmatpush.bf16.msra.mxu1 %v297_v40 }
  0x10   :  { %171 = vmatpush.bf16.msra.mxu2 %v301_v43  ;;  %184 = vmatpush.bf16.msra.mxu3 %v305_v44 }
  0x12   :  { %338 = vmatmul.msk.bf16.vlgmr.msra.gmra.mxu0 %vm115_vm1, %v18_v51  ;;  %339 = vmatmul.msk.bf16.vlgmr.msra.gmra.mxu1 %vm115_vm1, %v18_v51 }
  0x13   :  { %195 = vmatpush.bf16.msrb.mxu0 %v133_v47  ;;  %208 = vmatpush.bf16.msrb.mxu1 %v136_v48 }
  0x14   :  { %340 = vmatmul.msk.bf16.vlgmr.msra.gmra.mxu2 %vm115_vm1, %v18_v51  ;;  %341 = vmatmul.msk.bf16.vlgmr.msra.gmra.mxu3 %vm115_vm1, %v18_v51 }
  0x17   :  { %196 = vmatpush.bf16.msrb.mxu0 %v333_v52  ;;  %209 = vmatpush.bf16.msrb.mxu1 %v337_v53 }
  0x1b   :  { %197 = vmatpush.bf16.msrb.mxu0 %v309_v58  ;;  %210 = vmatpush.bf16.msrb.mxu1 %v313_v59 }
  0x22   :  { %342 = vmatmul.msk.bf16.vlgmr.msrb.gmra.mxu0 %vm115_vm1, %v18_v51  ;;  %343 = vmatmul.msk.bf16.vlgmr.msrb.gmra.mxu1 %vm115_vm1, %v18_v51 }
  0x7b   :  { %v38_v60 = vpop.permute.xlu0 %37 }
  0x8f   :  { %v147_v61 = vpop.f32.mrf.mxu0  ;;  %v160_v62 = vpop.f32.mrf.mxu1 }
  0x90   :  { %v148_v63 = vadd.f32 %v147_v61, %v38_v60  ;;  %v161_v0 = vadd.f32 %v160_v62, %v38_v60 }
  0x92   :  { %v216_v1 = vmax.f32 %v148_v63, 0.0  ;;  %v217_v2 = vmax.f32 %v161_v0, 0.0 }
  0x94   :  { %222 = vst [vmem:[%s515_s3] sm:$0xff] %v216_v1  ;;  %v264_v12 = vmul.f32 %v216_v1, %v216_v1  ;;  %v265_v13 = vmul.f32 %v217_v2, %v217_v2  ;;  %v255_v15 = vadd.f32 %v217_v2, %v216_v1 }
  0x95   :  { %223 = vst [vmem:[%s515_s3 + $0x8] sm:$0xff] %v217_v2 }
  0x96   :  { %v270_v18 = vadd.f32 %v265_v13, %v264_v12 }
  0x97   :  { %v173_v4 = vpop.f32.mrf.mxu2  ;;  %v186_v5 = vpop.f32.mrf.mxu3 }
  0x98   :  { %v174_v6 = vadd.f32 %v173_v4, %v38_v60  ;;  %v187_v7 = vadd.f32 %v186_v5, %v38_v60  ;;  %v149_v8 = vpop.f32.mrf.mxu0  ;;  %v162_v9 = vpop.f32.mrf.mxu1 }
  0x9a   :  { %v218_v10 = vmax.f32 %v174_v6, 0.0  ;;  %v219_v14 = vmax.f32 %v187_v7, 0.0 }
  0x9c   :  { %224 = vst [vmem:[%s515_s3 + $0x10] sm:$0xff] %v218_v10  ;;  %v266_v16 = vmul.f32 %v218_v10, %v218_v10  ;;  %v256_v19 = vadd.f32 %v255_v15, %v218_v10  ;;  %v267_v24 = vmul.f32 %v219_v14, %v219_v14 }
  0x9d   :  { %225 = vst [vmem:[%s515_s3 + $0x18] sm:$0xff] %v219_v14 }
  0x9e   :  { %v271_v27 = vadd.f32 %v270_v18, %v266_v16  ;;  %v257_v30 = vadd.f32 %v256_v19, %v219_v14 }
  0x9f   :  { %v175_v20 = vpop.f32.mrf.mxu2  ;;  %v188_v21 = vpop.f32.mrf.mxu3 }
  0xa0   :  { %v199_v22 = vpop.f32.mrf.mxu0  ;;  %v212_v23 = vpop.f32.mrf.mxu1  ;;  %v272_v34 = vadd.f32 %v271_v27, %v267_v24 }
  0xa1   :  { %v200_v25 = vadd.f32 %v199_v22, %v38_v60  ;;  %v213_v26 = vadd.f32 %v212_v23, %v38_v60 }
  0xa3   :  { %v220_v28 = vmax.f32 %v200_v25, 0.0  ;;  %v221_v29 = vmax.f32 %v213_v26, 0.0 }
  0xa5   :  { %226 = vst [vmem:[%s515_s3 + $0x20] sm:$0xff] %v220_v28  ;;  %v254_v31 = vsel %vm248_vm2, %v221_v29, 0.0  ;;  %v258_v32 = vadd.f32 %v257_v30, %v220_v28  ;;  %v268_v33 = vmul.f32 %v220_v28, %v220_v28 }
  0xa6   :  { %227 = vst [vmem:[%s515_s3 + $0x28] sm:$0xff] %v221_v29  ;;  %v269_v35 = vmul.f32 %v254_v31, %v254_v31 }
  0xa7   :  { %v259_v36 = vadd.f32 %v258_v32, %v254_v31  ;;  %v273_v37 = vadd.f32 %v272_v34, %v268_v33 }
  0xa8   :  { %v201_v38 = vpop.f32.mrf.mxu0  ;;  %v214_v39 = vpop.f32.mrf.mxu1 }
  0xa9   :  { %260 = vadd.xlane.f32.xlu0 %v259_v36  ;;  %v274_v40 = vadd.f32 %v273_v37, %v269_v35 }
  0xab   :  { %275 = vadd.xlane.f32.xlu1 %v274_v40 }
 0x11c   :  { %v261_v41 = vpop.xlane.xlu0 %260 }
 0x11d   :  { %263 = vst.msk [vmem:[%s516_s4] sm:$0xff] %vm262_vm3, %v261_v41 }
 0x11e   :  { %v276_v42 = vpop.xlane.xlu1 %275 }
 0x11f   :  { %277 = vst.msk [vmem:[%s517_s5] sm:$0xff] %vm262_vm3, %v276_v42 }

// kernel: _lambda_.7
= control target key start
LH: loop header
LB: loop body
LE: loop exit
PB: predicated region body
PF: predicated region fallthrough
CT: control target
= control target key end

     0   :  { %v245_v2 = vmov 0   ;;  %vm51_vm0 = vcmask 1043456   ;;  %vm47_vm1 = vcmask 31744   ;;  %s350_s1 = inlined_call_operand.vmem [shape: f32[4,768], index: 1, kind: input, shape index: {}]   ;;  %s351_s4 = inlined_call_operand.vmem [shape: f32[8,1], index: 4, kind: input, shape index: {}]   ;;  %s352_s5 = inlined_call_operand.vmem [shape: f32[8,1], index: 5, kind: input, shape index: {}]   ;;  %s353_s2 = inlined_call_operand.vmem [shape: f32[8,4], index: 2, kind: input, shape index: {}]   ;;  %s354_s3 = inlined_call_operand.vmem [shape: f32[8,1], index: 3, kind: input, shape index: {}]   ;;  %s355_s0 = inlined_call_operand.vmem [shape: f32[8,768], index: 0, kind: input, shape index: {}]   ;;  %s356_s6 = inlined_call_operand.vmem [shape: f32[8,768], index: 6, kind: output, shape index: {}]  }
   0x1   :  { %v24_v0 = vld [vmem:[%s350_s1] sm:$0xff]  ;;  %v25_v1 = vld [vmem:[%s350_s1 + $0x8] sm:$0xff]  ;;  %243 = vset.pattern.permute.xlu0 %v245_v2  ;;  %244 = vset.pattern.permute.xlu1 %v245_v2  ;;  %v26_v3 = vld [vmem:[%s350_s1 + $0x10] sm:$0xff] }
   0x2   :  { %36 = vst [vmem:[#allocation1] ss:$2 sm:$0xff] %v24_v0  ;;  %v190_v4 = vld [vmem:[%s351_s4] sm:$0xff]  ;;  %v185_v16 = vld [vmem:[%s355_s0 + $0x8] sm:$0xff]  ;;  %v186_v27 = vld [vmem:[%s355_s0 + $0x10] sm:$0xff] }
   0x3   :  { %v202_v5 = vld [vmem:[%s352_s5] sm:$0xff]  ;;  %38 = vst [vmem:[#allocation1 + $0x10] ss:$2 sm:$0xff] %v25_v1  ;;  %193 = vperm.xlu0 %243, %v190_v4   ;;  %v187_v28 = vld [vmem:[%s355_s0 + $0x18] sm:$0xff]  ;;  %v189_v30 = vld [vmem:[%s355_s0 + $0x28] sm:$0xff] }
   0x4   :  { %205 = vperm.xlu1 %244, %v202_v5   ;;  %40 = vst [vmem:[#allocation1 + $0x20] ss:$2 sm:$0xff] %v26_v3  ;;  %v23_v6 = vld [vmem:[%s353_s2] sm:$0xff] }
   0x5   :  { %v27_v13 = vld [vmem:[%s354_s3] sm:$0xff] }
   0x6   :  { %v184_v15 = vld [vmem:[%s355_s0] sm:$0xff] }
   0x7   :  { %v188_v29 = vld [vmem:[%s355_s0 + $0x20] sm:$0xff] }
   0x9   :  { %v41_v7 = vld.sshfl [vmem:[#allocation1] sm:$0xff pattern:$0x75316420]  ;;  %v42_v8 = vld.sshfl [vmem:[#allocation1 + $0x8] sm:$0xff pattern:$0x75316420] }
   0xa   :  { %230 = vmatpush.msk.msra.mxu0 %vm51_vm0, %v41_v7  ;;  %232 = vmatpush.msk.msra.mxu1 %vm51_vm0, %v42_v8  ;;  %v43_v9 = vld.sshfl [vmem:[#allocation1 + $0x10] sm:$0xff pattern:$0x75316420]  ;;  %v44_v10 = vld.sshfl [vmem:[#allocation1 + $0x18] sm:$0xff pattern:$0x75316420] }
   0xb   :  { %234 = vmatpush.msk.msra.mxu2 %vm51_vm0, %v43_v9  ;;  %236 = vmatpush.msk.msra.mxu3 %vm51_vm0, %v44_v10  ;;  %v45_v11 = vld.sshfl [vmem:[#allocation1 + $0x20] sm:$0xff pattern:$0x75316420]  ;;  %v46_v12 = vld.sshfl [vmem:[#allocation1 + $0x28] sm:$0xff pattern:$0x75316420] }
   0xc   :  { %231 = vmatmul.msk.f32.vlgmr.msra.gmra.mxu0 %vm47_vm1, %v23_v6  ;;  %233 = vmatmul.msk.f32.vlgmr.msra.gmra.mxu1 %vm47_vm1, %v23_v6 }
   0xd   :  { %235 = vmatmul.msk.f32.vlgmr.msra.gmra.mxu2 %vm47_vm1, %v23_v6  ;;  %237 = vmatmul.msk.f32.vlgmr.msra.gmra.mxu3 %vm47_vm1, %v23_v6 }
   0xe   :  { %238 = vmatpush.msk.msrb.mxu0 %vm51_vm0, %v45_v11  ;;  %240 = vmatpush.msk.msrb.mxu1 %vm51_vm0, %v46_v12 }
   0xf   :  { %30 = vperm.xlu0 %243, %v27_v13  }
  0x14   :  { %239 = vmatmul.msk.f32.vlgmr.msrb.gmra.mxu0 %vm47_vm1, %v23_v6  ;;  %241 = vmatmul.msk.f32.vlgmr.msrb.gmra.mxu1 %vm47_vm1, %v23_v6 }
  0x75   :  { %v194_v14 = vpop.permute.xlu0 %193 }
  0x76   :  { %v196_v17 = vmul.f32 %v194_v14, %v184_v15  ;;  %v197_v18 = vmul.f32 %v194_v14, %v185_v16  ;;  %v206_v19 = vpop.permute.xlu1 %205  ;;  %v198_v33 = vmul.f32 %v194_v14, %v186_v27  ;;  %v199_v34 = vmul.f32 %v194_v14, %v187_v28 }
  0x77   :  { %v200_v35 = vmul.f32 %v194_v14, %v188_v29  ;;  %v201_v36 = vmul.f32 %v194_v14, %v189_v30 }
  0x78   :  { %v208_v21 = vadd.f32 %v206_v19, %v196_v17  ;;  %v209_v22 = vadd.f32 %v206_v19, %v197_v18  ;;  %v210_v40 = vadd.f32 %v206_v19, %v198_v33  ;;  %v211_v42 = vadd.f32 %v206_v19, %v199_v34 }
  0x79   :  { %v212_v46 = vadd.f32 %v206_v19, %v200_v35  ;;  %v213_v48 = vadd.f32 %v206_v19, %v201_v36 }
  0x81   :  { %v31_v20 = vpop.permute.xlu0 %30 }
  0x89   :  { %v81_v23 = vpop.f32.mrf.mxu0  ;;  %v101_v24 = vpop.f32.mrf.mxu1 }
  0x8a   :  { %v82_v25 = vadd.f32 %v81_v23, %v31_v20  ;;  %v102_v26 = vadd.f32 %v101_v24, %v31_v20 }
  0x8c   :  { %v214_v31 = vadd.f32 %v208_v21, %v82_v25  ;;  %v215_v32 = vadd.f32 %v209_v22, %v102_v26 }
  0x8e   :  { %220 = vst [vmem:[%s356_s6] sm:$0xff] %v214_v31 }
  0x8f   :  { %221 = vst [vmem:[%s356_s6 + $0x8] sm:$0xff] %v215_v32 }
  0x90   :  { %v121_v37 = vpop.f32.mrf.mxu2  ;;  %v141_v38 = vpop.f32.mrf.mxu3 }
  0x91   :  { %v122_v39 = vadd.f32 %v121_v37, %v31_v20  ;;  %v142_v41 = vadd.f32 %v141_v38, %v31_v20  ;;  %v161_v43 = vpop.f32.mrf.mxu0  ;;  %v181_v44 = vpop.f32.mrf.mxu1 }
  0x92   :  { %v162_v45 = vadd.f32 %v161_v43, %v31_v20  ;;  %v182_v47 = vadd.f32 %v181_v44, %v31_v20 }
  0x93   :  { %v216_v49 = vadd.f32 %v210_v40, %v122_v39  ;;  %v217_v50 = vadd.f32 %v211_v42, %v142_v41 }
  0x94   :  { %v218_v51 = vadd.f32 %v212_v46, %v162_v45  ;;  %v219_v52 = vadd.f32 %v213_v48, %v182_v47 }
  0x95   :  { %222 = vst [vmem:[%s356_s6 + $0x10] sm:$0xff] %v216_v49 }
  0x96   :  { %223 = vst [vmem:[%s356_s6 + $0x18] sm:$0xff] %v217_v50 }
  0x97   :  { %224 = vst [vmem:[%s356_s6 + $0x20] sm:$0xff] %v218_v51 }
  0x98   :  { %225 = vst [vmem:[%s356_s6 + $0x28] sm:$0xff] %v219_v52 }

</bundles_post_ra>
